<compile_context>
chip_gen: v7x
topology: tpu7x:2x2x1
jax: 0.10.0
libtpu: 0.0.40
codegen_flags: <defaults>
</compile_context>

<pallas_src>
import jax
import jax.numpy as jnp
from jax import lax
from jax.experimental import pallas as pl
from jax.experimental.pallas import tpu as pltpu

EPS = 1e-5          # nn.LayerNorm default eps
KSIZE = 5           # Conv1d kernel_size
POOL = 2            # MaxPool1d kernel_size


def _conv_block_kernel(x_ref, w_ref, bias_ref, gamma_ref, beta_ref, o_ref):
    # x_ref block: (TB, C, L) in the module's NCL layout.
    x = x_ref[...].astype(jnp.float32)
    TB, C, L = x.shape
    Lout = L - (KSIZE - 1)
    Lp = Lout // POOL

    # ---- layout: NCL -> channels-last (TB, L, C); in-kernel transpose saves
    # two full HBM read+write passes vs. wrapper-level jnp.transpose. ----
    xt = jnp.transpose(x, (0, 2, 1))

    # ---- 1) LayerNorm over channels (last dim), f32 ----
    mean = jnp.mean(xt, axis=-1, keepdims=True)
    xc = xt - mean
    var = jnp.mean(xc * xc, axis=-1, keepdims=True)      # biased, as nn.LayerNorm
    xn = xc * lax.rsqrt(var + EPS) * gamma_ref[...] + beta_ref[...]

    # ---- 2) ReLU (+ bf16 cast: MXU wants bf16 operands, f32 accumulation) ----
    a = jnp.maximum(xn, 0.0).astype(jnp.bfloat16)

    # ---- 3) Conv1d(C, C, kernel_size=5, stride=1, padding=0) as ONE im2col
    # matmul: slab[b, t, k*C + ci] = a[b, t+k, ci]; w_ref is (K*C, C_out). ----
    slab = jnp.concatenate([a[:, k:k + Lout, :] for k in range(KSIZE)], axis=-1)
    conv = jnp.dot(slab.reshape(TB * Lout, KSIZE * C), w_ref[...],
                   preferred_element_type=jnp.float32)
    conv = conv.reshape(TB, Lout, C)

    # ---- 4) Dropout: identity in eval mode ----
    # TODO(synk): training-mode dropout would use pltpu.prng_seed + prng_random_bits.

    # ---- 5) MaxPool1d(kernel_size=2) along time (floor semantics).  Conv bias
    # is per-channel-constant, so max(a+b, c+b) == max(a, c) + b and it is
    # folded in after the pool. ----
    pooled = jnp.max(conv[:, :Lp * POOL, :].reshape(TB, Lp, POOL, C), axis=2)
    y = pooled + bias_ref[...]

    # ---- layout: back to NCL (TB, C, Lp); lane dim = pooled time axis. ----
    o_ref[...] = jnp.transpose(y, (0, 2, 1)).astype(o_ref.dtype)


def _pick_tb(B, L, C, Lout, vmem_budget_bytes=8 << 20):
    """Largest-needed batch tile: big enough that TB*Lout feeds the MXU,
    small enough that the double-buffered block set stays well under VMEM."""
    per_b = (4 * C * L                       # f32 input block
             + 2 * KSIZE * C * Lout          # bf16 im2col slab
             + 4 * C * Lout                  # f32 conv accumulator
             + 4 * C * (Lout // POOL))       # output block
    cap = max(1, vmem_budget_bytes // max(1, 2 * per_b))
    tb = 1
    for cand in range(1, B + 1):
        if B % cand != 0 or cand > cap:
            continue
        tb = cand
        if cand * Lout >= 256:               # enough matmul rows for the MXU
            break
    return tb


def conv_block_ribonn(x_ncl, w, bias, gamma, beta):
    """x_ncl: (B, C, L) float32 (PyTorch Conv1d layout). Returns (B, C, (L-4)//2)."""
    B, C, L = x_ncl.shape
    Lout = L - (KSIZE - 1)
    Lp = Lout // POOL
    TB = _pick_tb(B, L, C, Lout)

    # Tiny one-time parameter transforms (no full-tensor HBM passes here):
    # PyTorch conv weight (C_out, C_in, K) -> (K*C_in, C_out), bf16 for the MXU.
    w_flat = jnp.transpose(w, (2, 1, 0)).reshape(KSIZE * C, C).astype(jnp.bfloat16)
    bias2 = bias.reshape(1, C).astype(jnp.float32)
    gamma2 = gamma.reshape(1, C).astype(jnp.float32)
    beta2 = beta.reshape(1, C).astype(jnp.float32)

    return pl.pallas_call(
        _conv_block_kernel,
        out_shape=jax.ShapeDtypeStruct((B, C, Lp), x_ncl.dtype),
        grid=(B // TB,),
        in_specs=[
            pl.BlockSpec((TB, C, L), lambda b: (b, 0, 0)),        # x (NCL, batch tile)
            pl.BlockSpec((KSIZE * C, C), lambda b: (0, 0)),       # im2col conv weight
            pl.BlockSpec((1, C), lambda b: (0, 0)),               # conv bias
            pl.BlockSpec((1, C), lambda b: (0, 0)),               # LN gamma
            pl.BlockSpec((1, C), lambda b: (0, 0)),               # LN beta
        ],
        out_specs=pl.BlockSpec((TB, C, Lp), lambda b: (b, 0, 0)),
        compiler_params=pltpu.CompilerParams(
            dimension_semantics=("parallel",)),
    )(x_ncl, w_flat, bias2, gamma2, beta2)


def _reference(x_ncl, w, bias, gamma, beta):
    """Pure-JAX f32 reference mirroring the PyTorch forward (eval mode)."""
    x = jnp.transpose(x_ncl, (0, 2, 1))                  # (B, L, C)
    mean = x.mean(-1, keepdims=True)
    var = ((x - mean) ** 2).mean(-1, keepdims=True)
    x = (x - mean) / jnp.sqrt(var + EPS) * gamma + beta
    x = jnp.transpose(x, (0, 2, 1))                      # (B, C, L)
    x = jnp.maximum(x, 0.0)
    y = lax.conv_general_dilated(x, w, window_strides=(1,), padding="VALID",
                                 dimension_numbers=("NCH", "OIH", "NCH"))
    y = y + bias[None, :, None]
    B, C, Lout = y.shape
    Lp = Lout // POOL
    y = y[:, :, : Lp * POOL].reshape(B, C, Lp, POOL).max(-1)
    return y


if __name__ == "__main__":
    B, C, L = 2, 8, 16
    key = jax.random.PRNGKey(0)
    kx, kw, kb, kg, kbeta = jax.random.split(key, 5)

    x = jax.random.normal(kx, (B, C, L), dtype=jnp.float32)
    # Deterministic synthetic parameters (shapes from the module __init__).
    w = jax.random.normal(kw, (C, C, KSIZE), dtype=jnp.float32) * 0.1   # (C_out, C_in, K)
    bias = jax.random.normal(kb, (C,), dtype=jnp.float32) * 0.1
    gamma = 1.0 + 0.1 * jax.random.normal(kg, (C,), dtype=jnp.float32)
    beta = 0.1 * jax.random.normal(kbeta, (C,), dtype=jnp.float32)

    out = conv_block_ribonn(x, w, bias, gamma, beta)
    out = jax.block_until_ready(out)

    ref = _reference(x, w, bias, gamma, beta)
    assert out.shape == (B, C, (L - (KSIZE - 1)) // POOL), out.shape
    # bf16 matmul operands with f32 accumulation -> loosened tolerance.
    assert jnp.allclose(out, ref, atol=2e-2, rtol=2e-2), float(jnp.abs(out - ref).max())
    print("KERNEL_OK")
</pallas_src>

<mosaic_0001>
module attributes {stable_mosaic.version = 11 : i64} {
  func.func @_conv_block_kernel(%arg0: i32, %arg1: memref<2x8x16xf32, #tpu.memory_space<vmem>>, %arg2: memref<40x8xbf16, #tpu.memory_space<vmem>>, %arg3: memref<1x8xf32, #tpu.memory_space<vmem>>, %arg4: memref<1x8xf32, #tpu.memory_space<vmem>>, %arg5: memref<1x8xf32, #tpu.memory_space<vmem>>, %arg6: memref<2x8x6xf32, #tpu.memory_space<vmem>>) attributes {dimension_semantics = [#tpu.dimension_semantics<parallel>], iteration_bounds = array<i64: 1>, scalar_prefetch = 0 : i64, scratch_operands = 0 : i64, tpu.core_type = #tpu.core_type<tc>, window_params = [{transform_indices = @transform_0, window_bounds = array<i64: 2, 8, 16>}, {pipeline_mode = #tpu.pipeline_mode<synchronous>, transform_indices = @transform_1, window_bounds = array<i64: 40, 8>}, {pipeline_mode = #tpu.pipeline_mode<synchronous>, transform_indices = @transform_2, window_bounds = array<i64: 1, 8>}, {pipeline_mode = #tpu.pipeline_mode<synchronous>, transform_indices = @transform_3, window_bounds = array<i64: 1, 8>}, {pipeline_mode = #tpu.pipeline_mode<synchronous>, transform_indices = @transform_4, window_bounds = array<i64: 1, 8>}, {transform_indices = @transform_5, window_bounds = array<i64: 2, 8, 6>}]} {
    %c0 = arith.constant 0 : index
    %c0_0 = arith.constant 0 : index
    %c0_1 = arith.constant 0 : index
    %0 = vector.load %arg1[%c0, %c0_0, %c0_1] : memref<2x8x16xf32, #tpu.memory_space<vmem>>, vector<2x8x16xf32>
    %1 = tpu.transpose %0, [0, 2, 1] : vector<2x8x16xf32> -> vector<2x16x8xf32>
    %cst = arith.constant dense<0.000000e+00> : vector<2x16xf32>
    %2 = vector.multi_reduction <add>, %1, %cst [2] : vector<2x16x8xf32> to vector<2x16xf32>
    %3 = vector.shape_cast %2 : vector<2x16xf32> to vector<2x16x1xf32>
    %cst_2 = arith.constant 8.000000e+00 : f32
    %4 = vector.broadcast %cst_2 : f32 to vector<2x16x1xf32>
    %5 = arith.divf %3, %4 : vector<2x16x1xf32>
    %6 = vector.broadcast %5 : vector<2x16x1xf32> to vector<2x16x8xf32>
    %7 = arith.subf %1, %6 : vector<2x16x8xf32>
    %8 = arith.mulf %7, %7 : vector<2x16x8xf32>
    %cst_3 = arith.constant dense<0.000000e+00> : vector<2x16xf32>
    %9 = vector.multi_reduction <add>, %8, %cst_3 [2] : vector<2x16x8xf32> to vector<2x16xf32>
    %10 = vector.shape_cast %9 : vector<2x16xf32> to vector<2x16x1xf32>
    %cst_4 = arith.constant 8.000000e+00 : f32
    %11 = vector.broadcast %cst_4 : f32 to vector<2x16x1xf32>
    %12 = arith.divf %10, %11 : vector<2x16x1xf32>
    %cst_5 = arith.constant 9.99999974E-6 : f32
    %13 = vector.broadcast %cst_5 : f32 to vector<2x16x1xf32>
    %14 = arith.addf %12, %13 : vector<2x16x1xf32>
    %15 = math.rsqrt %14 : vector<2x16x1xf32>
    %16 = vector.broadcast %15 : vector<2x16x1xf32> to vector<2x16x8xf32>
    %17 = arith.mulf %7, %16 : vector<2x16x8xf32>
    %c0_6 = arith.constant 0 : index
    %c0_7 = arith.constant 0 : index
    %18 = vector.load %arg4[%c0_6, %c0_7] : memref<1x8xf32, #tpu.memory_space<vmem>>, vector<1x8xf32>
    %19 = vector.shape_cast %18 : vector<1x8xf32> to vector<1x1x8xf32>
    %20 = vector.broadcast %19 : vector<1x1x8xf32> to vector<2x16x8xf32>
    %21 = arith.mulf %17, %20 : vector<2x16x8xf32>
    %c0_8 = arith.constant 0 : index
    %c0_9 = arith.constant 0 : index
    %22 = vector.load %arg5[%c0_8, %c0_9] : memref<1x8xf32, #tpu.memory_space<vmem>>, vector<1x8xf32>
    %23 = vector.shape_cast %22 : vector<1x8xf32> to vector<1x1x8xf32>
    %24 = vector.broadcast %23 : vector<1x1x8xf32> to vector<2x16x8xf32>
    %25 = arith.addf %21, %24 : vector<2x16x8xf32>
    %cst_10 = arith.constant 0.000000e+00 : f32
    %26 = vector.broadcast %cst_10 : f32 to vector<2x16x8xf32>
    %27 = arith.maximumf %25, %26 : vector<2x16x8xf32>
    %28 = arith.truncf %27 : vector<2x16x8xf32> to vector<2x16x8xbf16>
    %29 = vector.extract_strided_slice %28 {offsets = [0, 0, 0], sizes = [2, 12, 8], strides = [1, 1, 1]} : vector<2x16x8xbf16> to vector<2x12x8xbf16>
    %30 = vector.extract_strided_slice %28 {offsets = [0, 1, 0], sizes = [2, 12, 8], strides = [1, 1, 1]} : vector<2x16x8xbf16> to vector<2x12x8xbf16>
    %31 = vector.extract_strided_slice %28 {offsets = [0, 2, 0], sizes = [2, 12, 8], strides = [1, 1, 1]} : vector<2x16x8xbf16> to vector<2x12x8xbf16>
    %32 = vector.extract_strided_slice %28 {offsets = [0, 3, 0], sizes = [2, 12, 8], strides = [1, 1, 1]} : vector<2x16x8xbf16> to vector<2x12x8xbf16>
    %33 = vector.extract_strided_slice %28 {offsets = [0, 4, 0], sizes = [2, 12, 8], strides = [1, 1, 1]} : vector<2x16x8xbf16> to vector<2x12x8xbf16>
    %34 = tpu.concatenate %29, %30, %31, %32, %33 in 2 : vector<2x12x8xbf16>, vector<2x12x8xbf16>, vector<2x12x8xbf16>, vector<2x12x8xbf16>, vector<2x12x8xbf16> -> vector<2x12x40xbf16>
    %35 = vector.shape_cast %34 : vector<2x12x40xbf16> to vector<24x40xbf16>
    %c0_11 = arith.constant 0 : index
    %c0_12 = arith.constant 0 : index
    %36 = vector.load %arg2[%c0_11, %c0_12] : memref<40x8xbf16, #tpu.memory_space<vmem>>, vector<40x8xbf16>
    %cst_13 = arith.constant dense<0.000000e+00> : vector<24x8xf32>
    %37 = tpu.matmul %35, %36, %cst_13 {dimension_numbers = #tpu.dot_dimension_numbers<[1], [0], [0], [1], [0, 0, 1, 1], [], []>} : vector<24x40xbf16>, vector<40x8xbf16>, vector<24x8xf32> -> vector<24x8xf32>
    %38 = vector.shape_cast %37 : vector<24x8xf32> to vector<2x12x8xf32>
    %39 = vector.shape_cast %38 : vector<2x12x8xf32> to vector<2x6x2x8xf32>
    %cst_14 = arith.constant dense<0xFF800000> : vector<2x6x8xf32>
    %40 = vector.multi_reduction <maximumf>, %39, %cst_14 [2] : vector<2x6x2x8xf32> to vector<2x6x8xf32>
    %c0_15 = arith.constant 0 : index
    %c0_16 = arith.constant 0 : index
    %41 = vector.load %arg3[%c0_15, %c0_16] : memref<1x8xf32, #tpu.memory_space<vmem>>, vector<1x8xf32>
    %42 = vector.shape_cast %41 : vector<1x8xf32> to vector<1x1x8xf32>
    %43 = vector.broadcast %42 : vector<1x1x8xf32> to vector<2x6x8xf32>
    %44 = arith.addf %40, %43 : vector<2x6x8xf32>
    %45 = tpu.transpose %44, [0, 2, 1] : vector<2x6x8xf32> -> vector<2x8x6xf32>
    %c0_17 = arith.constant 0 : index
    %c0_18 = arith.constant 0 : index
    %c0_19 = arith.constant 0 : index
    %46 = vector.load %arg6[%c0_17, %c0_18, %c0_19] : memref<2x8x6xf32, #tpu.memory_space<vmem>>, vector<2x8x6xf32>
    tpu.vector_store %arg6[%c0_17, %c0_18, %c0_19], %45 {strides = array<i32>} : memref<2x8x6xf32, #tpu.memory_space<vmem>>, vector<2x8x6xf32>,
    return
  }
  func.func @transform_0(%arg0: i32) -> (i32, i32, i32) {
    %c0_i32 = arith.constant 0 : i32
    %c0_i32_0 = arith.constant 0 : i32
    %c0_i32_1 = arith.constant 0 : i32
    return %arg0, %c0_i32, %c0_i32_0 : i32, i32, i32
  }
  func.func @transform_1(%arg0: i32) -> (i32, i32) {
    %c0_i32 = arith.constant 0 : i32
    %c0_i32_0 = arith.constant 0 : i32
    %c0_i32_1 = arith.constant 0 : i32
    return %c0_i32, %c0_i32_0 : i32, i32
  }
  func.func @transform_2(%arg0: i32) -> (i32, i32) {
    %c0_i32 = arith.constant 0 : i32
    %c0_i32_0 = arith.constant 0 : i32
    %c0_i32_1 = arith.constant 0 : i32
    return %c0_i32, %c0_i32_0 : i32, i32
  }
  func.func @transform_3(%arg0: i32) -> (i32, i32) {
    %c0_i32 = arith.constant 0 : i32
    %c0_i32_0 = arith.constant 0 : i32
    %c0_i32_1 = arith.constant 0 : i32
    return %c0_i32, %c0_i32_0 : i32, i32
  }
  func.func @transform_4(%arg0: i32) -> (i32, i32) {
    %c0_i32 = arith.constant 0 : i32
    %c0_i32_0 = arith.constant 0 : i32
    %c0_i32_1 = arith.constant 0 : i32
    return %c0_i32, %c0_i32_0 : i32, i32
  }
  func.func @transform_5(%arg0: i32) -> (i32, i32, i32) {
    %c0_i32 = arith.constant 0 : i32
    %c0_i32_0 = arith.constant 0 : i32
    %c0_i32_1 = arith.constant 0 : i32
    return %arg0, %c0_i32, %c0_i32_0 : i32, i32, i32
  }
}

</mosaic_0001>

<bundles_post_ra>
// kernel: tpu_custom_call.1
= control target key start
LH: loop header
LB: loop body
LE: loop exit
PB: predicated region body
PF: predicated region fallthrough
CT: control target
= control target key end

     0   :  { %vm87_vm0 = vcmask 64512   ;;  %s691_s25 = smov 8   ;;  %s692_s30 = smov 24   ;;  %vm316_vm1 = vcmask 1043456   ;;  %vm215_vm2 = vcmask 130048   ;;  %vm220_vm3 = vcmask 195584   ;;  %s817_s0 = inlined_call_operand.vmem [shape: f32[2,8,16], index: 0, kind: input, shape index: {}]   ;;  %s818_s3 = inlined_call_operand.vmem [shape: f32[1,8], index: 3, kind: input, shape index: {}]   ;;  %s819_s4 = inlined_call_operand.vmem [shape: f32[1,8], index: 4, kind: input, shape index: {}]   ;;  %s820_s1 = inlined_call_operand.vmem [shape: bf16[40,8], index: 1, kind: input, shape index: {}]   ;;  %s821_s2 = inlined_call_operand.vmem [shape: f32[1,8], index: 2, kind: input, shape index: {}]   ;;  %s822_s5 = inlined_call_operand.vmem [shape: f32[2,8,6], index: 5, kind: output, shape index: {}]  }
   0x1   :  { %v21_v0 = vld [vmem:[%s817_s0] sm:$0xff]  ;;  %v22_v1 = vld [vmem:[%s817_s0 + $0x8] sm:$0xff]  ;;  %vm225_vm4 = vcmask 261120   ;;  %vm309_vm5 = vcmask 326656   ;;  %vm434_vm6 = vcmask 58368   ;;  %vm551_vm7 = vcmask 1041409  }
   0x2   :  { %23 = vxpose.xlu0.b32.start.end [1/1] (short) (narrow) %v21_v0, 16  ;;  %v648_v45 = vld [vmem:[%s818_s3] ss:$0 sm:$0xff]  ;;  %s689_s3 = smov 32   ;;  %vm554_vm8 = vcmask 1042434   ;;  %vm557_vm9 = vcmask 1043459  }
   0x3   :  { %v649_v49 = vld [vmem:[%s819_s4] ss:$0 sm:$0xff]  ;;  %s690_s4 = smov 16   ;;  %vm560_vm10 = vcmask 1044484   ;;  %vm563_vm11 = vcmask 1045509   ;;  %vm641_vm12 = vcmask 48128  }
   0x7   :  { %55 = vxpose.xlu0.b32.start.end [1/1] (short) (narrow) %v22_v1, 16 }
  0x82   :  { %v39_v2 = vpop.trf.xlu0 }
  0x83   :  { %v88_v3 = vsel %vm87_vm0, %v39_v2, 0.0 }
  0x84   :  { %89 = vadd.xlane.f32.xlu1 %v88_v3 }
  0x86   :  { %v40_v4 = vpop.trf.xlu0 }
  0x87   :  { %v91_v5 = vsel %vm87_vm0, %v40_v4, 0.0 }
  0x88   :  { %92 = vadd.xlane.f32.xlu1 %v91_v5 }
  0x8a   :  { %v71_v6 = vpop.trf.xlu0 }
  0x8b   :  { %v94_v7 = vsel %vm87_vm0, %v71_v6, 0.0 }
  0x8c   :  { %95 = vadd.xlane.f32.xlu1 %v94_v7 }
  0x8e   :  { %v72_v8 = vpop.trf.xlu0 }
  0x8f   :  { %v97_v9 = vsel %vm87_vm0, %v72_v8, 0.0 }
  0x90   :  { %98 = vadd.xlane.f32.xlu0 %v97_v9 }
 0x111   :  { %v90_v10 = vpop.xlane.xlu1 %89 }
 0x112   :  { %v101_v11 = vmul.f32 0.125, %v90_v10 }
 0x114   :  { %v105_v12 = vsub.f32 %v39_v2, %v101_v11 }
 0x115   :  { %v93_v13 = vpop.xlane.xlu1 %92 }
 0x116   :  { %v109_v14 = vmul.f32 %v105_v12, %v105_v12  ;;  %v102_v15 = vmul.f32 0.125, %v93_v13 }
 0x118   :  { %v113_v16 = vsel %vm87_vm0, %v109_v14, 0.0  ;;  %v106_v19 = vsub.f32 %v40_v4, %v102_v15 }
 0x119   :  { %114 = vadd.xlane.f32.xlu1 %v113_v16  ;;  %v96_v17 = vpop.xlane.xlu1 %95  ;;  %v679_v16 = vld [vmem:[%s820_s1 + $0x8] sm:$0xff]  }
 0x11a   :  { %v103_v18 = vmul.f32 0.125, %v96_v17  ;;  %v110_v26 = vmul.f32 %v106_v19, %v106_v19 }
 0x11c   :  { %v107_v20 = vsub.f32 %v71_v6, %v103_v18  ;;  %v116_v27 = vsel %vm87_vm0, %v110_v26, 0.0  ;;  %v693_v26 = vmov 1983009808  }
 0x11d   :  { %v99_v21 = vpop.xlane.xlu0 %98 }
 0x11e   :  { %v104_v22 = vmul.f32 0.125, %v99_v21  ;;  %v111_v23 = vmul.f32 %v107_v20, %v107_v20 }
 0x120   :  { %v108_v24 = vsub.f32 %v72_v8, %v104_v22  ;;  %v119_v25 = vsel %vm87_vm0, %v111_v23, 0.0 }
 0x121   :  { %120 = vadd.xlane.f32.xlu1 %v119_v25 }
 0x122   :  { %v112_v28 = vmul.f32 %v108_v24, %v108_v24 }
 0x124   :  { %v122_v29 = vsel %vm87_vm0, %v112_v28, 0.0  ;;  %v236_v28 = vlaneseq }
 0x125   :  { %117 = vadd.xlane.f32.xlu1 %v116_v27  ;;  %v234_v27 = vunpack.c.l.s4 %v693_v26 }
 0x129   :  { %123 = vadd.xlane.f32.xlu1 %v122_v29 }
 0x1a6   :  { %v115_v30 = vpop.xlane.xlu1 %114 }
 0x1a7   :  { %v125_v31 = vmul.f32 0.125, %v115_v30  ;;  %v235_v30 = vunpack.c.0.s8 %v234_v27 }
 0x1a9   :  { %v129_v32 = vadd.f32 1e-05, %v125_v31  ;;  %v237_v31 = vshrl.u32 %v236_v28, 7 }
 0x1ab   :  { %681 = vrsqrt.f32 %v129_v32 }
 0x1ae   :  { %v121_v33 = vpop.xlane.xlu1 %120 }
 0x1af   :  { %v127_v34 = vmul.f32 0.125, %v121_v33 }
 0x1b1   :  { %v131_v35 = vadd.f32 1e-05, %v127_v34  ;;  %v756_v34 = vsub.s32 %v235_v30, %v237_v31 }
 0x1b2   :  { %v118_v36 = vpop.xlane.xlu1 %117 }
 0x1b3   :  { %683 = vrsqrt.f32 %v131_v35  ;;  %v126_v37 = vmul.f32 0.125, %v118_v36 }
 0x1b5   :  { %v130_v38 = vadd.f32 1e-05, %v126_v37  ;;  %v682_v41 = vpop.eup %681 }
 0x1b6   :  { %v124_v39 = vpop.xlane.xlu1 %123  ;;  %v137_v43 = vmul.f32 %v682_v41, %v105_v12  ;;  %v678_v12 = vld [vmem:[%s820_s1] sm:$0xff]  }
 0x1b7   :  { %685 = vrsqrt.f32 %v130_v38  ;;  %v128_v40 = vmul.f32 0.125, %v124_v39  ;;  %661 = vmatprep.subr.bf16.mxu0 %v678_v12 }
 0x1b8   :  { %v148_v46 = vmul.f32 %v648_v45, %v137_v43  ;;  %662 = vmatpush3.bf16.msra.mxu0 %v678_v12 }
 0x1b9   :  { %v132_v42 = vadd.f32 1e-05, %v128_v40  ;;  %663 = vmatprep.subr.bf16.mxu0 %v679_v16 }
 0x1ba   :  { %v159_v51 = vadd.f32 %v649_v49, %v148_v46 }
 0x1bb   :  { %687 = vrsqrt.f32 %v132_v42 }
 0x1bc   :  { %v163_v57 = vmax.f32 %v159_v51, 0.0  ;;  %664 = vmatpush3.bf16.msra.mxu0 %v679_v16 }
 0x1bd   :  { %v684_v44 = vpop.eup %683 }
 0x1be   :  { %v139_v47 = vmul.f32 %v684_v44, %v107_v20  ;;  %v680_v20 = vld [vmem:[%s820_s1 + $0x10] ss:$0 sps:$4 sm:$0xff]  }
 0x1bf   :  { %671 = vmatprep.subr.msk.bf16.mxu0 %vm316_vm1, %v680_v20  ;;  %v318_v22 = vsel %vm316_vm1, %v680_v20, 0 }
 0x1c0   :  { %v150_v52 = vmul.f32 %v648_v45, %v139_v47  ;;  %666 = vmatpush3.bf16.msra.mxu0 %v318_v22 }
 0x1c1   :  { %v686_v48 = vpop.eup %685 }
 0x1c2   :  { %v138_v50 = vmul.f32 %v686_v48, %v106_v19  ;;  %v161_v58 = vadd.f32 %v649_v49, %v150_v52 }
 0x1c4   :  { %v149_v53 = vmul.f32 %v648_v45, %v138_v50  ;;  %v165_v63 = vmax.f32 %v161_v58, 0.0 }
 0x1c5   :  { %v688_v54 = vpop.eup %687 }
 0x1c6   :  { %v160_v55 = vadd.f32 %v649_v49, %v149_v53  ;;  %v140_v56 = vmul.f32 %v688_v54, %v108_v24 }
 0x1c8   :  { %v164_v59 = vmax.f32 %v160_v55, 0.0  ;;  %v151_v60 = vmul.f32 %v648_v45, %v140_v56 }
 0x1ca   :  { %v162_v61 = vadd.f32 %v649_v49, %v151_v60  ;;  %v167_v62 = vpack.c.bf16 %v164_v59, %v163_v57 }
 0x1cc   :  { %v166_v0 = vmax.f32 %v162_v61, 0.0  ;;  %v205_v1 = vrot.slane %v167_v62, 2  ;;  %v189_v2 = vrot.slane %v167_v62, 1  ;;  %v172_v3 = vshll.u32 %v167_v62, 16 }
 0x1cd   :  { %v170_v8 = vshrl.u32 %v167_v62, 16 }
 0x1ce   :  { %207 = vrot.lane.b32.xlu0 %v205_v1, %s689_s3  ;;  %191 = vrot.lane.b32.xlu1 %v189_v2, %s690_s4  ;;  %v168_v4 = vpack.c.bf16 %v166_v0, %v165_v63  ;;  %v174_v6 = vrot.slane %v172_v3, 1  ;;  %v196_v15 = vrot.slane %v172_v3, 2 }
 0x1cf   :  { %v195_v14 = vrot.slane %v170_v8, 1 }
 0x1d0   :  { %v190_v5 = vrot.slane %v168_v4, 1  ;;  %v179_v7 = vshll.u32 %v168_v4, 16  ;;  %v175_v9 = vor.u32 %v174_v6, %v170_v8  ;;  %v177_v11 = vshrl.u32 %v168_v4, 16 }
 0x1d1   :  { %v197_v17 = vor.u32 %v196_v15, %v195_v14  ;;  %v206_v23 = vrot.slane %v168_v4, 2 }
 0x1d2   :  { %193 = vrot.lane.b32.xlu1 %v190_v5, %s690_s4  ;;  %v181_v10 = vrot.slane %v179_v7, 1  ;;  %v198_v18 = vrot.slane %v177_v11, 1  ;;  %v199_v19 = vrot.slane %v179_v7, 2 }
 0x1d4   :  { %v182_v13 = vor.u32 %v181_v10, %v177_v11  ;;  %v200_v21 = vor.u32 %v199_v19, %v198_v18 }
 0x1d6   :  { %183 = vrot.lane.b32.xlu1 %v175_v9, %s691_s25 }
 0x1da   :  { %185 = vrot.lane.b32.xlu1 %v182_v13, %s691_s25 }
 0x1de   :  { %201 = vrot.lane.b32.xlu1 %v197_v17, %s692_s30 }
 0x1e2   :  { %203 = vrot.lane.b32.xlu1 %v200_v21, %s692_s30 }
 0x1e6   :  { %209 = vrot.lane.b32.xlu1 %v206_v23, %s689_s3 }
 0x240   :  { %v192_v24 = vpop.permute.xlu1 %191  ;;  %v208_v37 = vpop.permute.xlu0 %207 }
 0x244   :  { %v194_v25 = vpop.permute.xlu1 %193 }
 0x248   :  { %v184_v29 = vpop.permute.xlu1 %183 }
 0x249   :  { %v212_v33 = vsel %vm87_vm0, %v167_v62, %v184_v29 }
 0x24a   :  { %v217_v35 = vsel %vm215_vm2, %v212_v33, %v192_v24 }
 0x24c   :  { %v186_v32 = vpop.permute.xlu1 %185 }
 0x24d   :  { %v214_v41 = vsel %vm87_vm0, %v168_v4, %v186_v32 }
 0x24e   :  { %v219_v45 = vsel %vm215_vm2, %v214_v41, %v194_v25 }
 0x250   :  { %v202_v36 = vpop.permute.xlu1 %201 }
 0x251   :  { %v222_v38 = vsel %vm220_vm3, %v217_v35, %v202_v36 }
 0x252   :  { %v227_v39 = vsel %vm225_vm4, %v222_v38, %v208_v37 }
 0x253   :  { %v239_v40 = vrot.slane %v227_v39, %v756_v34  ;;  %v232_v43 = vcombine.high %v227_v39, %v227_v39 }
 0x254   :  { %v204_v42 = vpop.permute.xlu1 %203 }
 0x255   :  { %v247_v44 = vcombine.high %v239_v40, %v239_v40  ;;  %v224_v46 = vsel %vm220_vm3, %v219_v45, %v204_v42  ;;  %v246_v49 = vrot.slane %v232_v43, %v756_v34 }
 0x257   :  { %v269_v52 = vcombine.low %v239_v40, %v247_v44 }
 0x258   :  { %v210_v47 = vpop.permute.xlu1 %209 }
 0x259   :  { %v229_v48 = vsel %vm225_vm4, %v224_v46, %v210_v47  ;;  %v277_v57 = vrot.slane %v269_v52, %v756_v34 }
 0x25a   :  { %v248_v50 = vcombine.high %v229_v48, %v229_v48  ;;  %v255_v51 = vrot.slane %v229_v48, %v756_v34 }
 0x25c   :  { %v262_v53 = vrot.slane %v248_v50, %v756_v34  ;;  %v263_v54 = vcombine.high %v255_v51, %v255_v51  ;;  %v270_v55 = vcombine.low %v246_v49, %v255_v51 }
 0x25e   :  { %v286_v56 = vcombine.low %v263_v54, %v262_v53  ;;  %v284_v58 = vrot.slane %v270_v55, %v756_v34 }
 0x260   :  { %v285_v59 = vcombine.low %v277_v57, %v284_v58  ;;  %v293_v60 = vrot.slane %v286_v56, %v756_v34 }
 0x262   :  { %667 = vmatprep.mubr.msk.bf16.mxu0 %vm309_vm5, %v285_v59 }
 0x263   :  { %668 = vmatmul.mubr.msk.bf16.vlgmr.msra.gmra.mrb[0].mxu0 %vm309_vm5, %v293_v60 }
 0x336   :  { %v669_v61 = vpop.f32.mrb[0].mxu0 }
 0x337   :  { %v405_v62 = vcombine.high %v669_v61, %v669_v61  ;;  %v412_v63 = vrot.slane %v669_v61, %v756_v34  ;;  %v354_v0 = vpop.f32.mrb[1].mxu0  ;;  %v784_v61 = vld [vmem:[%s821_s2] ss:$0 sm:$0xff] }
 0x338   :  { %v371_v1 = vcombine.high %v354_v0, %v354_v0  ;;  %v378_v2 = vrot.slane %v354_v0, %v756_v34  ;;  %v670_v3 = vpop.f32.mrb[2].mxu0 }
 0x339   :  { %v419_v4 = vrot.slane %v405_v62, %v756_v34  ;;  %v420_v5 = vcombine.high %v412_v63, %v412_v63  ;;  %v491_v6 = vsel %vm434_vm6, %v412_v63, -inf  ;;  %v357_v7 = vpop.f32.mrb[3].mxu0 }
 0x33a   :  { %v492_v8 = vrot.slane %v491_v6, 4  ;;  %v385_v9 = vrot.slane %v371_v1, %v756_v34  ;;  %v386_v10 = vcombine.high %v378_v2, %v378_v2  ;;  %v435_v11 = vsel %vm434_vm6, %v378_v2, -inf }
 0x33b   :  { %v498_v12 = vsel %vm434_vm6, %v420_v5, -inf  ;;  %v505_v13 = vsel %vm434_vm6, %v419_v4, -inf  ;;  %v436_v14 = vrot.slane %v435_v11, 4  ;;  %v421_v15 = vcombine.high %v419_v4, %v419_v4 }
 0x33c   :  { %v499_v16 = vrot.slane %v498_v12, 4  ;;  %v387_v17 = vcombine.high %v385_v9, %v385_v9  ;;  %v442_v19 = vsel %vm434_vm6, %v386_v10, -inf  ;;  %v449_v20 = vsel %vm434_vm6, %v385_v9, -inf }
 0x33d   :  { %v437_v18 = vmax.f32 %v435_v11, %v436_v14  ;;  %v493_v21 = vmax.f32 %v491_v6, %v492_v8  ;;  %v506_v22 = vrot.slane %v505_v13, 4  ;;  %v443_v24 = vrot.slane %v442_v19, 4 }
 0x33e   :  { %v450_v25 = vrot.slane %v449_v20, 4  ;;  %v456_v26 = vsel %vm434_vm6, %v387_v17, -inf  ;;  %v500_v27 = vmax.f32 %v498_v12, %v499_v16  ;;  %v512_v28 = vsel %vm434_vm6, %v421_v15, -inf }
 0x33f   :  { %v438_v23 = vrot.slane %v437_v18, 2  ;;  %v444_v29 = vmax.f32 %v442_v19, %v443_v24  ;;  %v457_v31 = vrot.slane %v456_v26, 4  ;;  %v494_v32 = vrot.slane %v493_v21, 2 }
 0x340   :  { %v451_v30 = vmax.f32 %v449_v20, %v450_v25  ;;  %v507_v33 = vmax.f32 %v505_v13, %v506_v22  ;;  %v513_v36 = vrot.slane %v512_v28, 4  ;;  %v501_v40 = vrot.slane %v500_v27, 2 }
 0x341   :  { %v439_v35 = vmax.f32 %v437_v18, %v438_v23  ;;  %v445_v37 = vrot.slane %v444_v29, 2  ;;  %v458_v39 = vmax.f32 %v456_v26, %v457_v31  ;;  %v388_v41 = vcombine.high %v357_v7, %v357_v7 }
 0x342   :  { %v452_v38 = vrot.slane %v451_v30, 2  ;;  %v495_v45 = vmax.f32 %v493_v21, %v494_v32  ;;  %v508_v46 = vrot.slane %v507_v33, 2  ;;  %v395_v48 = vrot.slane %v357_v7, %v756_v34 }
 0x343   :  { %v446_v42 = vmax.f32 %v444_v29, %v445_v37  ;;  %v459_v44 = vrot.slane %v458_v39, 2  ;;  %v440_v47 = vrot.slane %v439_v35, 1  ;;  %v514_v49 = vmax.f32 %v512_v28, %v513_v36 }
 0x344   :  { %v453_v43 = vmax.f32 %v451_v30, %v452_v38  ;;  %v502_v53 = vmax.f32 %v500_v27, %v501_v40  ;;  %v402_v54 = vrot.slane %v388_v41, %v756_v34  ;;  %v403_v55 = vcombine.high %v395_v48, %v395_v48 }
 0x345   :  { %v447_v50 = vrot.slane %v446_v42, 1  ;;  %v460_v52 = vmax.f32 %v458_v39, %v459_v44  ;;  %v463_v56 = vsel %vm434_vm6, %v395_v48, -inf  ;;  %v441_v62 = vmax.f32 %v439_v35, %v440_v47 }
 0x346   :  { %v454_v51 = vrot.slane %v453_v43, 1  ;;  %v464_v60 = vrot.slane %v463_v56, 4  ;;  %v404_v63 = vcombine.high %v402_v54, %v402_v54  ;;  %v470_v0 = vsel %vm434_vm6, %v403_v55, -inf }
 0x347   :  { %v448_v57 = vmax.f32 %v446_v42, %v447_v50  ;;  %v461_v59 = vrot.slane %v460_v52, 1  ;;  %v477_v1 = vsel %vm434_vm6, %v402_v54, -inf  ;;  %v471_v3 = vrot.slane %v470_v0, 4 }
 0x348   :  { %v455_v58 = vmax.f32 %v453_v43, %v454_v51  ;;  %v465_v2 = vmax.f32 %v463_v56, %v464_v60  ;;  %v478_v4 = vrot.slane %v477_v1, 4  ;;  %v515_v5 = vrot.slane %v514_v49, 2 }
 0x349   :  { %v527_v34 = vadd.f32 %v784_v61, %v448_v57  ;;  %v484_v6 = vsel %vm434_vm6, %v404_v63, -inf  ;;  %v462_v7 = vmax.f32 %v460_v52, %v461_v59  ;;  %v472_v11 = vmax.f32 %v470_v0, %v471_v3 }
 0x34a   :  { %v528_v8 = vadd.f32 %v784_v61, %v455_v58  ;;  %v466_v10 = vrot.slane %v465_v2, 2  ;;  %v479_v12 = vmax.f32 %v477_v1, %v478_v4  ;;  %v509_v13 = vmax.f32 %v507_v33, %v508_v46 }
 0x34b   :  { %v550_v9 = vrot.slane %v527_v34, 7  ;;  %v526_v14 = vadd.f32 %v784_v61, %v441_v62  ;;  %v485_v15 = vrot.slane %v484_v6, 4  ;;  %v529_v16 = vadd.f32 %v784_v61, %v462_v7 }
 0x34c   :  { %v467_v17 = vmax.f32 %v465_v2, %v466_v10  ;;  %v473_v18 = vrot.slane %v472_v11, 2  ;;  %v480_v19 = vrot.slane %v479_v12, 2  ;;  %v553_v20 = vrot.slane %v528_v8, 6 }
 0x34d   :  { %v486_v21 = vmax.f32 %v484_v6, %v485_v15  ;;  %v552_v22 = vsel %vm551_vm7, %v550_v9, %v526_v14  ;;  %v516_v23 = vmax.f32 %v514_v49, %v515_v5  ;;  %v496_v24 = vrot.slane %v495_v45, 1 }
 0x34e   :  { %v468_v25 = vrot.slane %v467_v17, 1  ;;  %v474_v26 = vmax.f32 %v472_v11, %v473_v18  ;;  %v481_v27 = vmax.f32 %v479_v12, %v480_v19  ;;  %v503_v28 = vrot.slane %v502_v53, 1 }
 0x34f   :  { %v487_v29 = vrot.slane %v486_v21, 2  ;;  %v556_v30 = vrot.slane %v529_v16, 5  ;;  %v510_v31 = vrot.slane %v509_v13, 1  ;;  %v555_v35 = vsel %vm554_vm8, %v553_v20, %v552_v22 }
 0x350   :  { %v469_v32 = vmax.f32 %v467_v17, %v468_v25  ;;  %v475_v33 = vrot.slane %v474_v26, 1  ;;  %v482_v36 = vrot.slane %v481_v27, 1  ;;  %v517_v38 = vrot.slane %v516_v23, 1 }
 0x351   :  { %v488_v37 = vmax.f32 %v486_v21, %v487_v29  ;;  %v497_v39 = vmax.f32 %v495_v45, %v496_v24  ;;  %v504_v42 = vmax.f32 %v502_v53, %v503_v28  ;;  %v558_v44 = vsel %vm557_vm9, %v556_v30, %v555_v35 }
 0x352   :  { %v476_v40 = vmax.f32 %v474_v26, %v475_v33  ;;  %v530_v41 = vadd.f32 %v784_v61, %v469_v32  ;;  %v511_v46 = vmax.f32 %v509_v13, %v510_v31  ;;  %v483_v49 = vmax.f32 %v481_v27, %v482_v36 }
 0x353   :  { %v489_v43 = vrot.slane %v488_v37, 1  ;;  %v518_v51 = vmax.f32 %v516_v23, %v517_v38  ;;  %v534_v52 = vadd.f32 %v784_v61, %v497_v39  ;;  %v535_v53 = vadd.f32 %v784_v61, %v504_v42 }
 0x354   :  { %v531_v47 = vadd.f32 %v784_v61, %v476_v40  ;;  %v559_v48 = vrot.slane %v530_v41, 4  ;;  %v536_v57 = vadd.f32 %v784_v61, %v511_v46  ;;  %v532_v58 = vadd.f32 %v784_v61, %v483_v49 }
 0x355   :  { %v490_v50 = vmax.f32 %v488_v37, %v489_v43  ;;  %v537_v60 = vadd.f32 %v784_v61, %v518_v51  ;;  %v567_v62 = vrot.slane %v534_v52, 6  ;;  %v569_v0 = vrot.slane %v535_v53, 5 }
 0x356   :  { %v561_v45 = vsel %vm560_vm10, %v559_v48, %v558_v44  ;;  %v562_v54 = vrot.slane %v531_v47, 3  ;;  %v571_v34 = vrot.slane %v536_v57, 4 }
 0x357   :  { %v533_v55 = vadd.f32 %v784_v61, %v490_v50  ;;  %v573_v3 = vrot.slane %v537_v60, 3 }
 0x358   :  { %v564_v56 = vsel %vm563_vm11, %v562_v54, %v561_v45 }
 0x359   :  { %v565_v59 = vrot.slane %v533_v55, 7  ;;  %577 = vxpose.xlu1.b32.start.end [1/1] (short) (narrow) %v564_v56, 8 }
 0x35b   :  { %v566_v63 = vsel %vm551_vm7, %v565_v59, %v532_v58 }
 0x35c   :  { %v568_v1 = vsel %vm554_vm8, %v567_v62, %v566_v63 }
 0x35d   :  { %v570_v2 = vsel %vm557_vm9, %v569_v0, %v568_v1 }
 0x35e   :  { %v572_v4 = vsel %vm560_vm10, %v571_v34, %v570_v2 }
 0x35f   :  { %v574_v5 = vsel %vm563_vm11, %v573_v3, %v572_v4 }
 0x360   :  { %609 = vxpose.xlu0.b32.start.end [1/1] (short) (narrow) %v574_v5, 8 }
 0x3d9   :  { %v593_v6 = vpop.trf.xlu1 }
 0x3da   :  { %642 = vst.msk [vmem:[%s822_s5] sm:$0xff] %vm641_vm12, %v593_v6 }
 0x3e0   :  { %v625_v61 = vpop.trf.xlu0 }
 0x3e1   :  { %643 = vst.msk [vmem:[%s822_s5 + $0x8] sm:$0xff] %vm641_vm12, %v625_v61 }

</bundles_post_ra>
